<compile_context>
chip_gen: v5e
topology: v5e:2x2
jax: 0.10.0
libtpu: 0.0.40
codegen_flags: <defaults>
</compile_context>

<pallas_src>
import functools

import jax
import jax.numpy as jnp
from jax.experimental import pallas as pl
from jax.experimental.pallas import tpu as pltpu


def _round_up(x, m):
    return ((x + m - 1) // m) * m


def autoencoder_kernel(x_ref,
                       w1_ref, b1_ref, w2_ref, b2_ref, w3_ref, b3_ref,
                       bn_scale_ref, bn_shift_ref,
                       w4_ref, b4_ref, w5_ref, b5_ref, w6_ref, b6_ref,
                       out_ref):
    # x and all weights are bf16 (MXU-friendly); matmuls accumulate in f32;
    # bias add / ReLU / BatchNorm scale+shift stay in f32.
    def dense(h_bf16, w_ref, b_ref):
        return jnp.dot(h_bf16, w_ref[...],
                       preferred_element_type=jnp.float32) + b_ref[...]

    x = x_ref[...]                                             # bf16 (tile_b, in_p)

    # ----- encoder: Linear -> ReLU -> [Dropout] -> Linear -> ReLU -> [Dropout] -> Linear
    h = jnp.maximum(dense(x, w1_ref, b1_ref), 0.0)
    h = jnp.maximum(dense(h.astype(jnp.bfloat16), w2_ref, b2_ref), 0.0)
    z = dense(h.astype(jnp.bfloat16), w3_ref, b3_ref)

    # ----- decoder: BatchNorm1d (folded) -> Linear -> ReLU -> Linear -> ReLU -> Linear
    z = z * bn_scale_ref[...] + bn_shift_ref[...]
    h = jnp.maximum(dense(z.astype(jnp.bfloat16), w4_ref, b4_ref), 0.0)
    h = jnp.maximum(dense(h.astype(jnp.bfloat16), w5_ref, b5_ref), 0.0)
    y = dense(h.astype(jnp.bfloat16), w6_ref, b6_ref)

    out_ref[...] = y.astype(out_ref.dtype)


def _resident_spec(shape):
    # Whole-array block with a constant block index: the pipeline fetches it once
    # and never re-DMAs it across grid steps (all params are 2-D here).
    return pl.BlockSpec(shape, lambda i: (0, 0))


@functools.partial(jax.jit, static_argnames=("tile_b",))
def autoencoder_forward(x, params, *, tile_b=None):
    """params: (w1,b1,w2,b2,w3,b3,bn_scale,bn_shift,w4,b4,w5,b5,w6,b6), PyTorch-like
    shapes with W stored as (fan_in, fan_out) and biases/bn as (1, fan_out)."""
    (w1, b1, w2, b2, w3, b3, bn_scale, bn_shift, w4, b4, w5, b5, w6, b6) = params
    B, in_shape = x.shape
    enc_shape = w3.shape[1]

    LANE = 128
    in_p = _round_up(in_shape, LANE)     # lane-dense input / output features
    h1 = 128                              # already lane-aligned
    h2 = _round_up(64, LANE)             # 64 -> 128
    enc_p = _round_up(enc_shape, LANE)   # encoded dim -> 128

    def pad2(a, rows, cols, dtype):
        a = a.astype(dtype)
        return jnp.pad(a, ((0, rows - a.shape[0]), (0, cols - a.shape[1])))

    wdt = jnp.bfloat16
    pparams = (
        pad2(w1, in_p, h1, wdt),   pad2(b1, 1, h1, jnp.float32),
        pad2(w2, h1, h2, wdt),     pad2(b2, 1, h2, jnp.float32),
        pad2(w3, h2, enc_p, wdt),  pad2(b3, 1, enc_p, jnp.float32),
        pad2(bn_scale, 1, enc_p, jnp.float32),
        pad2(bn_shift, 1, enc_p, jnp.float32),
        pad2(w4, enc_p, h2, wdt),  pad2(b4, 1, h2, jnp.float32),
        pad2(w5, h2, h1, wdt),     pad2(b5, 1, h1, jnp.float32),
        pad2(w6, h1, in_p, wdt),   pad2(b6, 1, in_p, jnp.float32),
    )

    # --- tile_b selection: as big as a conservative VMEM budget allows (bounded by
    #     v7x's 64 MiB physical / 32 MiB scoped VMEM), target 256 rows per step.
    if tile_b is None:
        budget = 24 * 1024 * 1024
        resident = sum(2 * int(p.size) * p.dtype.itemsize for p in pparams)  # 2x: pipeline bufs
        per_row = (2 * in_p * 2          # bf16 x tile, double-buffered
                   + 2 * in_p * 4        # f32 out tile, double-buffered
                   + 6 * max(in_p, h1, h2, enc_p) * 4)  # f32 intermediates (slack)
        cap = max(8, (budget - resident) // per_row)
        tile_b = int(min(256, _round_up(min(B, cap), 8)))
        if tile_b >= 128:                # keep big tiles MXU-friendly on v5e (128x128)
            tile_b = (tile_b // 128) * 128

    grid_b = pl.cdiv(B, tile_b)
    b_pad = grid_b * tile_b

    # Zero-pad batch (handles ragged B) and features; cast activations to bf16.
    x_p = jnp.pad(x.astype(jnp.bfloat16), ((0, b_pad - B), (0, in_p - in_shape)))

    in_specs = [pl.BlockSpec((tile_b, in_p), lambda i: (i, 0))]
    in_specs += [_resident_spec(p.shape) for p in pparams]

    flops = 2 * b_pad * (in_p * h1 + h1 * h2 + h2 * enc_p
                         + enc_p * h2 + h2 * h1 + h1 * in_p)
    bytes_accessed = (int(x_p.size) * x_p.dtype.itemsize
                      + sum(int(p.size) * p.dtype.itemsize for p in pparams)
                      + b_pad * in_p * 4)
    cost = pl.CostEstimate(flops=flops, transcendentals=0,
                           bytes_accessed=bytes_accessed)

    out_p = pl.pallas_call(
        autoencoder_kernel,
        out_shape=jax.ShapeDtypeStruct((b_pad, in_p), jnp.float32),
        grid_spec=pltpu.PrefetchScalarGridSpec(
            num_scalar_prefetch=0,
            grid=(grid_b,),
            in_specs=in_specs,
            out_specs=pl.BlockSpec((tile_b, in_p), lambda i: (i, 0)),
        ),
        compiler_params=pltpu.CompilerParams(
            dimension_semantics=("parallel",),
            vmem_limit_bytes=32 * 1024 * 1024,
        ),
        cost_estimate=cost,
    )(x_p, *pparams)

    return out_p[:B, :in_shape].astype(x.dtype)


def init_params(key, in_shape, enc_shape):
    """Deterministic init mimicking PyTorch nn.Linear default (uniform +/- 1/sqrt(fan_in))."""
    dims = [(in_shape, 128), (128, 64), (64, enc_shape),     # encoder
            (enc_shape, 64), (64, 128), (128, in_shape)]     # decoder
    weights, biases = [], []
    for (fan_in, fan_out) in dims:
        key, kw, kb = jax.random.split(key, 3)
        bound = 1.0 / jnp.sqrt(jnp.float32(fan_in))
        w = jax.random.uniform(kw, (fan_in, fan_out), jnp.float32, -bound, bound)
        b = jax.random.uniform(kb, (1, fan_out), jnp.float32, -bound, bound)
        weights.append(w)
        biases.append(b)

    # BatchNorm1d(enc_shape), eval mode: gamma=1, beta=0, running_mean=0,
    # running_var=1, eps=1e-5 -> fold into scale/shift.
    eps = 1e-5
    gamma = jnp.ones((1, enc_shape), jnp.float32)
    beta = jnp.zeros((1, enc_shape), jnp.float32)
    running_mean = jnp.zeros((1, enc_shape), jnp.float32)
    running_var = jnp.ones((1, enc_shape), jnp.float32)
    bn_scale = gamma / jnp.sqrt(running_var + eps)
    bn_shift = beta - running_mean * bn_scale

    (w1, w2, w3, w4, w5, w6) = weights
    (b1, b2, b3, b4, b5, b6) = biases
    return (w1, b1, w2, b2, w3, b3, bn_scale, bn_shift, w4, b4, w5, b5, w6, b6)


def reference_forward(x, params):
    (w1, b1, w2, b2, w3, b3, bn_scale, bn_shift, w4, b4, w5, b5, w6, b6) = params
    h = jnp.maximum(x @ w1 + b1, 0.0)
    h = jnp.maximum(h @ w2 + b2, 0.0)
    z = h @ w3 + b3
    z = z * bn_scale + bn_shift
    h = jnp.maximum(z @ w4 + b4, 0.0)
    h = jnp.maximum(h @ w5 + b5, 0.0)
    return h @ w6 + b6


if __name__ == "__main__":
    key = jax.random.PRNGKey(0)
    in_shape, enc_shape, batch = 32, 8, 16

    key, kx, kp = jax.random.split(key, 3)
    x = jax.random.normal(kx, (batch, in_shape), jnp.float32)
    params = init_params(kp, in_shape, enc_shape)

    out = autoencoder_forward(x, params)
    out = jax.block_until_ready(out)

    ref = reference_forward(x, params)
    assert out.shape == (batch, in_shape)
    max_err = float(jnp.max(jnp.abs(out - ref)))
    # bf16 matmul inputs (f32 accumulation) -> loosened tolerance vs f32 reference.
    assert jnp.allclose(out, ref, atol=5e-2, rtol=5e-2), \
        f"mismatch vs JAX reference (max abs err {max_err})"

    print("KERNEL_OK")
</pallas_src>

<mosaic_0001>
module attributes {stable_mosaic.version = 11 : i64} {
  func.func @autoencoder_kernel(%arg0: i32, %arg1: memref<16x128xbf16, #tpu.memory_space<vmem>>, %arg2: memref<128x128xbf16, #tpu.memory_space<vmem>>, %arg3: memref<1x128xf32, #tpu.memory_space<vmem>>, %arg4: memref<128x128xbf16, #tpu.memory_space<vmem>>, %arg5: memref<1x128xf32, #tpu.memory_space<vmem>>, %arg6: memref<128x128xbf16, #tpu.memory_space<vmem>>, %arg7: memref<1x128xf32, #tpu.memory_space<vmem>>, %arg8: memref<1x128xf32, #tpu.memory_space<vmem>>, %arg9: memref<1x128xf32, #tpu.memory_space<vmem>>, %arg10: memref<128x128xbf16, #tpu.memory_space<vmem>>, %arg11: memref<1x128xf32, #tpu.memory_space<vmem>>, %arg12: memref<128x128xbf16, #tpu.memory_space<vmem>>, %arg13: memref<1x128xf32, #tpu.memory_space<vmem>>, %arg14: memref<128x128xbf16, #tpu.memory_space<vmem>>, %arg15: memref<1x128xf32, #tpu.memory_space<vmem>>, %arg16: memref<16x128xf32, #tpu.memory_space<vmem>>) attributes {dimension_semantics = [#tpu.dimension_semantics<parallel>], iteration_bounds = array<i64: 1>, scalar_prefetch = 0 : i64, scratch_operands = 0 : i64, tpu.core_type = #tpu.core_type<tc>, window_params = [{transform_indices = @transform_0, window_bounds = array<i64: 16, 128>}, {pipeline_mode = #tpu.pipeline_mode<synchronous>, transform_indices = @transform_1, window_bounds = array<i64: 128, 128>}, {pipeline_mode = #tpu.pipeline_mode<synchronous>, transform_indices = @transform_2, window_bounds = array<i64: 1, 128>}, {pipeline_mode = #tpu.pipeline_mode<synchronous>, transform_indices = @transform_3, window_bounds = array<i64: 128, 128>}, {pipeline_mode = #tpu.pipeline_mode<synchronous>, transform_indices = @transform_4, window_bounds = array<i64: 1, 128>}, {pipeline_mode = #tpu.pipeline_mode<synchronous>, transform_indices = @transform_5, window_bounds = array<i64: 128, 128>}, {pipeline_mode = #tpu.pipeline_mode<synchronous>, transform_indices = @transform_6, window_bounds = array<i64: 1, 128>}, {pipeline_mode = #tpu.pipeline_mode<synchronous>, transform_indices = @transform_7, window_bounds = array<i64: 1, 128>}, {pipeline_mode = #tpu.pipeline_mode<synchronous>, transform_indices = @transform_8, window_bounds = array<i64: 1, 128>}, {pipeline_mode = #tpu.pipeline_mode<synchronous>, transform_indices = @transform_9, window_bounds = array<i64: 128, 128>}, {pipeline_mode = #tpu.pipeline_mode<synchronous>, transform_indices = @transform_10, window_bounds = array<i64: 1, 128>}, {pipeline_mode = #tpu.pipeline_mode<synchronous>, transform_indices = @transform_11, window_bounds = array<i64: 128, 128>}, {pipeline_mode = #tpu.pipeline_mode<synchronous>, transform_indices = @transform_12, window_bounds = array<i64: 1, 128>}, {pipeline_mode = #tpu.pipeline_mode<synchronous>, transform_indices = @transform_13, window_bounds = array<i64: 128, 128>}, {pipeline_mode = #tpu.pipeline_mode<synchronous>, transform_indices = @transform_14, window_bounds = array<i64: 1, 128>}, {transform_indices = @transform_15, window_bounds = array<i64: 16, 128>}]} {
    %c0 = arith.constant 0 : index
    %c0_0 = arith.constant 0 : index
    %0 = vector.load %arg1[%c0, %c0_0] : memref<16x128xbf16, #tpu.memory_space<vmem>>, vector<16x128xbf16>
    %c0_1 = arith.constant 0 : index
    %c0_2 = arith.constant 0 : index
    %1 = vector.load %arg2[%c0_1, %c0_2] : memref<128x128xbf16, #tpu.memory_space<vmem>>, vector<128x128xbf16>
    %cst = arith.constant dense<0.000000e+00> : vector<16x128xf32>
    %2 = tpu.matmul %0, %1, %cst {dimension_numbers = #tpu.dot_dimension_numbers<[1], [0], [0], [1], [0, 0, 1, 1], [], []>} : vector<16x128xbf16>, vector<128x128xbf16>, vector<16x128xf32> -> vector<16x128xf32>
    %c0_3 = arith.constant 0 : index
    %c0_4 = arith.constant 0 : index
    %3 = vector.load %arg3[%c0_3, %c0_4] : memref<1x128xf32, #tpu.memory_space<vmem>>, vector<1x128xf32>
    %4 = vector.broadcast %3 : vector<1x128xf32> to vector<16x128xf32>
    %5 = arith.addf %2, %4 : vector<16x128xf32>
    %cst_5 = arith.constant 0.000000e+00 : f32
    %6 = vector.broadcast %cst_5 : f32 to vector<16x128xf32>
    %7 = arith.maximumf %5, %6 : vector<16x128xf32>
    %8 = arith.truncf %7 : vector<16x128xf32> to vector<16x128xbf16>
    %c0_6 = arith.constant 0 : index
    %c0_7 = arith.constant 0 : index
    %9 = vector.load %arg4[%c0_6, %c0_7] : memref<128x128xbf16, #tpu.memory_space<vmem>>, vector<128x128xbf16>
    %cst_8 = arith.constant dense<0.000000e+00> : vector<16x128xf32>
    %10 = tpu.matmul %8, %9, %cst_8 {dimension_numbers = #tpu.dot_dimension_numbers<[1], [0], [0], [1], [0, 0, 1, 1], [], []>} : vector<16x128xbf16>, vector<128x128xbf16>, vector<16x128xf32> -> vector<16x128xf32>
    %c0_9 = arith.constant 0 : index
    %c0_10 = arith.constant 0 : index
    %11 = vector.load %arg5[%c0_9, %c0_10] : memref<1x128xf32, #tpu.memory_space<vmem>>, vector<1x128xf32>
    %12 = vector.broadcast %11 : vector<1x128xf32> to vector<16x128xf32>
    %13 = arith.addf %10, %12 : vector<16x128xf32>
    %cst_11 = arith.constant 0.000000e+00 : f32
    %14 = vector.broadcast %cst_11 : f32 to vector<16x128xf32>
    %15 = arith.maximumf %13, %14 : vector<16x128xf32>
    %16 = arith.truncf %15 : vector<16x128xf32> to vector<16x128xbf16>
    %c0_12 = arith.constant 0 : index
    %c0_13 = arith.constant 0 : index
    %17 = vector.load %arg6[%c0_12, %c0_13] : memref<128x128xbf16, #tpu.memory_space<vmem>>, vector<128x128xbf16>
    %cst_14 = arith.constant dense<0.000000e+00> : vector<16x128xf32>
    %18 = tpu.matmul %16, %17, %cst_14 {dimension_numbers = #tpu.dot_dimension_numbers<[1], [0], [0], [1], [0, 0, 1, 1], [], []>} : vector<16x128xbf16>, vector<128x128xbf16>, vector<16x128xf32> -> vector<16x128xf32>
    %c0_15 = arith.constant 0 : index
    %c0_16 = arith.constant 0 : index
    %19 = vector.load %arg7[%c0_15, %c0_16] : memref<1x128xf32, #tpu.memory_space<vmem>>, vector<1x128xf32>
    %20 = vector.broadcast %19 : vector<1x128xf32> to vector<16x128xf32>
    %21 = arith.addf %18, %20 : vector<16x128xf32>
    %c0_17 = arith.constant 0 : index
    %c0_18 = arith.constant 0 : index
    %22 = vector.load %arg8[%c0_17, %c0_18] : memref<1x128xf32, #tpu.memory_space<vmem>>, vector<1x128xf32>
    %23 = vector.broadcast %22 : vector<1x128xf32> to vector<16x128xf32>
    %24 = arith.mulf %21, %23 : vector<16x128xf32>
    %c0_19 = arith.constant 0 : index
    %c0_20 = arith.constant 0 : index
    %25 = vector.load %arg9[%c0_19, %c0_20] : memref<1x128xf32, #tpu.memory_space<vmem>>, vector<1x128xf32>
    %26 = vector.broadcast %25 : vector<1x128xf32> to vector<16x128xf32>
    %27 = arith.addf %24, %26 : vector<16x128xf32>
    %28 = arith.truncf %27 : vector<16x128xf32> to vector<16x128xbf16>
    %c0_21 = arith.constant 0 : index
    %c0_22 = arith.constant 0 : index
    %29 = vector.load %arg10[%c0_21, %c0_22] : memref<128x128xbf16, #tpu.memory_space<vmem>>, vector<128x128xbf16>
    %cst_23 = arith.constant dense<0.000000e+00> : vector<16x128xf32>
    %30 = tpu.matmul %28, %29, %cst_23 {dimension_numbers = #tpu.dot_dimension_numbers<[1], [0], [0], [1], [0, 0, 1, 1], [], []>} : vector<16x128xbf16>, vector<128x128xbf16>, vector<16x128xf32> -> vector<16x128xf32>
    %c0_24 = arith.constant 0 : index
    %c0_25 = arith.constant 0 : index
    %31 = vector.load %arg11[%c0_24, %c0_25] : memref<1x128xf32, #tpu.memory_space<vmem>>, vector<1x128xf32>
    %32 = vector.broadcast %31 : vector<1x128xf32> to vector<16x128xf32>
    %33 = arith.addf %30, %32 : vector<16x128xf32>
    %cst_26 = arith.constant 0.000000e+00 : f32
    %34 = vector.broadcast %cst_26 : f32 to vector<16x128xf32>
    %35 = arith.maximumf %33, %34 : vector<16x128xf32>
    %36 = arith.truncf %35 : vector<16x128xf32> to vector<16x128xbf16>
    %c0_27 = arith.constant 0 : index
    %c0_28 = arith.constant 0 : index
    %37 = vector.load %arg12[%c0_27, %c0_28] : memref<128x128xbf16, #tpu.memory_space<vmem>>, vector<128x128xbf16>
    %cst_29 = arith.constant dense<0.000000e+00> : vector<16x128xf32>
    %38 = tpu.matmul %36, %37, %cst_29 {dimension_numbers = #tpu.dot_dimension_numbers<[1], [0], [0], [1], [0, 0, 1, 1], [], []>} : vector<16x128xbf16>, vector<128x128xbf16>, vector<16x128xf32> -> vector<16x128xf32>
    %c0_30 = arith.constant 0 : index
    %c0_31 = arith.constant 0 : index
    %39 = vector.load %arg13[%c0_30, %c0_31] : memref<1x128xf32, #tpu.memory_space<vmem>>, vector<1x128xf32>
    %40 = vector.broadcast %39 : vector<1x128xf32> to vector<16x128xf32>
    %41 = arith.addf %38, %40 : vector<16x128xf32>
    %cst_32 = arith.constant 0.000000e+00 : f32
    %42 = vector.broadcast %cst_32 : f32 to vector<16x128xf32>
    %43 = arith.maximumf %41, %42 : vector<16x128xf32>
    %44 = arith.truncf %43 : vector<16x128xf32> to vector<16x128xbf16>
    %c0_33 = arith.constant 0 : index
    %c0_34 = arith.constant 0 : index
    %45 = vector.load %arg14[%c0_33, %c0_34] : memref<128x128xbf16, #tpu.memory_space<vmem>>, vector<128x128xbf16>
    %cst_35 = arith.constant dense<0.000000e+00> : vector<16x128xf32>
    %46 = tpu.matmul %44, %45, %cst_35 {dimension_numbers = #tpu.dot_dimension_numbers<[1], [0], [0], [1], [0, 0, 1, 1], [], []>} : vector<16x128xbf16>, vector<128x128xbf16>, vector<16x128xf32> -> vector<16x128xf32>
    %c0_36 = arith.constant 0 : index
    %c0_37 = arith.constant 0 : index
    %47 = vector.load %arg15[%c0_36, %c0_37] : memref<1x128xf32, #tpu.memory_space<vmem>>, vector<1x128xf32>
    %48 = vector.broadcast %47 : vector<1x128xf32> to vector<16x128xf32>
    %49 = arith.addf %46, %48 : vector<16x128xf32>
    %c0_38 = arith.constant 0 : index
    %c0_39 = arith.constant 0 : index
    %50 = vector.load %arg16[%c0_38, %c0_39] : memref<16x128xf32, #tpu.memory_space<vmem>>, vector<16x128xf32>
    tpu.vector_store %arg16[%c0_38, %c0_39], %49 {strides = array<i32>} : memref<16x128xf32, #tpu.memory_space<vmem>>, vector<16x128xf32>,
    return
  }
  func.func @transform_0(%arg0: i32) -> (i32, i32) {
    %c0_i32 = arith.constant 0 : i32
    %c0_i32_0 = arith.constant 0 : i32
    return %arg0, %c0_i32 : i32, i32
  }
  func.func @transform_1(%arg0: i32) -> (i32, i32) {
    %c0_i32 = arith.constant 0 : i32
    %c0_i32_0 = arith.constant 0 : i32
    %c0_i32_1 = arith.constant 0 : i32
    return %c0_i32, %c0_i32_0 : i32, i32
  }
  func.func @transform_2(%arg0: i32) -> (i32, i32) {
    %c0_i32 = arith.constant 0 : i32
    %c0_i32_0 = arith.constant 0 : i32
    %c0_i32_1 = arith.constant 0 : i32
    return %c0_i32, %c0_i32_0 : i32, i32
  }
  func.func @transform_3(%arg0: i32) -> (i32, i32) {
    %c0_i32 = arith.constant 0 : i32
    %c0_i32_0 = arith.constant 0 : i32
    %c0_i32_1 = arith.constant 0 : i32
    return %c0_i32, %c0_i32_0 : i32, i32
  }
  func.func @transform_4(%arg0: i32) -> (i32, i32) {
    %c0_i32 = arith.constant 0 : i32
    %c0_i32_0 = arith.constant 0 : i32
    %c0_i32_1 = arith.constant 0 : i32
    return %c0_i32, %c0_i32_0 : i32, i32
  }
  func.func @transform_5(%arg0: i32) -> (i32, i32) {
    %c0_i32 = arith.constant 0 : i32
    %c0_i32_0 = arith.constant 0 : i32
    %c0_i32_1 = arith.constant 0 : i32
    return %c0_i32, %c0_i32_0 : i32, i32
  }
  func.func @transform_6(%arg0: i32) -> (i32, i32) {
    %c0_i32 = arith.constant 0 : i32
    %c0_i32_0 = arith.constant 0 : i32
    %c0_i32_1 = arith.constant 0 : i32
    return %c0_i32, %c0_i32_0 : i32, i32
  }
  func.func @transform_7(%arg0: i32) -> (i32, i32) {
    %c0_i32 = arith.constant 0 : i32
    %c0_i32_0 = arith.constant 0 : i32
    %c0_i32_1 = arith.constant 0 : i32
    return %c0_i32, %c0_i32_0 : i32, i32
  }
  func.func @transform_8(%arg0: i32) -> (i32, i32) {
    %c0_i32 = arith.constant 0 : i32
    %c0_i32_0 = arith.constant 0 : i32
    %c0_i32_1 = arith.constant 0 : i32
    return %c0_i32, %c0_i32_0 : i32, i32
  }
  func.func @transform_9(%arg0: i32) -> (i32, i32) {
    %c0_i32 = arith.constant 0 : i32
    %c0_i32_0 = arith.constant 0 : i32
    %c0_i32_1 = arith.constant 0 : i32
    return %c0_i32, %c0_i32_0 : i32, i32
  }
  func.func @transform_10(%arg0: i32) -> (i32, i32) {
    %c0_i32 = arith.constant 0 : i32
    %c0_i32_0 = arith.constant 0 : i32
    %c0_i32_1 = arith.constant 0 : i32
    return %c0_i32, %c0_i32_0 : i32, i32
  }
  func.func @transform_11(%arg0: i32) -> (i32, i32) {
    %c0_i32 = arith.constant 0 : i32
    %c0_i32_0 = arith.constant 0 : i32
    %c0_i32_1 = arith.constant 0 : i32
    return %c0_i32, %c0_i32_0 : i32, i32
  }
  func.func @transform_12(%arg0: i32) -> (i32, i32) {
    %c0_i32 = arith.constant 0 : i32
    %c0_i32_0 = arith.constant 0 : i32
    %c0_i32_1 = arith.constant 0 : i32
    return %c0_i32, %c0_i32_0 : i32, i32
  }
  func.func @transform_13(%arg0: i32) -> (i32, i32) {
    %c0_i32 = arith.constant 0 : i32
    %c0_i32_0 = arith.constant 0 : i32
    %c0_i32_1 = arith.constant 0 : i32
    return %c0_i32, %c0_i32_0 : i32, i32
  }
  func.func @transform_14(%arg0: i32) -> (i32, i32) {
    %c0_i32 = arith.constant 0 : i32
    %c0_i32_0 = arith.constant 0 : i32
    %c0_i32_1 = arith.constant 0 : i32
    return %c0_i32, %c0_i32_0 : i32, i32
  }
  func.func @transform_15(%arg0: i32) -> (i32, i32) {
    %c0_i32 = arith.constant 0 : i32
    %c0_i32_0 = arith.constant 0 : i32
    return %arg0, %c0_i32 : i32, i32
  }
}

</mosaic_0001>

<bundles_post_ra>
// kernel: autoencoder_forward.1
= control target key start
LH: loop header
LB: loop body
LE: loop exit
PB: predicated region body
PF: predicated region fallthrough
CT: control target
= control target key end

     0   :  { %s1135_s0 = inlined_call_operand.vmem [shape: bf16[16,128], index: 0, kind: input, shape index: {}]   ;;  %s1136_s1 = inlined_call_operand.vmem [shape: bf16[128,128], index: 1, kind: input, shape index: {}]   ;;  %s1137_s2 = inlined_call_operand.vmem [shape: f32[1,128], index: 2, kind: input, shape index: {}]   ;;  %s1138_s3 = inlined_call_operand.vmem [shape: bf16[128,128], index: 3, kind: input, shape index: {}]   ;;  %s1139_s4 = inlined_call_operand.vmem [shape: f32[1,128], index: 4, kind: input, shape index: {}]   ;;  %s1140_s5 = inlined_call_operand.vmem [shape: bf16[128,128], index: 5, kind: input, shape index: {}]   ;;  %s1141_s6 = inlined_call_operand.vmem [shape: f32[1,128], index: 6, kind: input, shape index: {}]   ;;  %s1142_s7 = inlined_call_operand.vmem [shape: f32[1,128], index: 7, kind: input, shape index: {}]   ;;  %s1143_s8 = inlined_call_operand.vmem [shape: f32[1,128], index: 8, kind: input, shape index: {}]   ;;  %s1144_s9 = inlined_call_operand.vmem [shape: bf16[128,128], index: 9, kind: input, shape index: {}]   ;;  %s1145_s10 = inlined_call_operand.vmem [shape: f32[1,128], index: 10, kind: input, shape index: {}]   ;;  %s1146_s11 = inlined_call_operand.vmem [shape: bf16[128,128], index: 11, kind: input, shape index: {}]   ;;  %s1147_s12 = inlined_call_operand.vmem [shape: f32[1,128], index: 12, kind: input, shape index: {}]   ;;  %s1148_s13 = inlined_call_operand.vmem [shape: bf16[128,128], index: 13, kind: input, shape index: {}]   ;;  %s1149_s14 = inlined_call_operand.vmem [shape: f32[1,128], index: 14, kind: input, shape index: {}]   ;;  %s1150_s15 = inlined_call_operand.hbm [shape: f32[16,128], index: 15, kind: output, shape index: {}]  }
   0x1   :  { %v800_v0 = vld [vmem:[%s1136_s1 + $0x38] sm:$0xff]  ;;  %v799_v1 = vld [vmem:[%s1136_s1 + $0x30] sm:$0xff]  ;;  %v798_v3 = vld [vmem:[%s1136_s1 + $0x28] sm:$0xff] }
   0x2   :  { %127 = vmatpush.bf16.msra.mxu0 %v800_v0  ;;  %v808_v2 = vld [vmem:[%s1138_s3 + $0x38] sm:$0xff]  ;;  %v807_v4 = vld [vmem:[%s1138_s3 + $0x30] sm:$0xff] }
   0x3   :  { %212 = vmatpush.bf16.msra.mxu1 %v808_v2 }
   0x6   :  { %128 = vmatpush.bf16.msra.mxu0 %v799_v1 }
   0x7   :  { %20 = vsyncpa [#allocation3], 0  ;;  %213 = vmatpush.bf16.msra.mxu1 %v807_v4  ;;  %v806_v5 = vld [vmem:[%s1138_s3 + $0x28] sm:$0xff]  ;;  %v797_v6 = vld [vmem:[%s1136_s1 + $0x20] sm:$0xff]  ;;  %s880_s16 = smov 8  }
   0x8   :  { %v805_v7 = vld [vmem:[%s1138_s3 + $0x20] sm:$0xff]  ;;  %v796_v8 = vld [vmem:[%s1136_s1 + $0x18] sm:$0xff]  ;;  %v795_v9 = vld [vmem:[%s1136_s1 + $0x10] sm:$0xff] }
   0x9   :  { %v794_v10 = vld [vmem:[%s1136_s1 + $0x8] sm:$0xff]  ;;  %v793_v11 = vld [vmem:[%s1136_s1] sm:$0xff]  ;;  %v804_v13 = vld [vmem:[%s1138_s3 + $0x18] sm:$0xff] }
   0xa   :  { %129 = vmatpush.bf16.msra.mxu0 %v798_v3  ;;  %v792_v12 = vld [vmem:[%s1135_s0] sm:$0xff]  ;;  %v803_v14 = vld [vmem:[%s1138_s3 + $0x10] sm:$0xff]  ;;  %v802_v15 = vld [vmem:[%s1138_s3 + $0x8] sm:$0xff] }
   0xb   :  { %214 = vmatpush.bf16.msra.mxu1 %v806_v5  ;;  %v801_v16 = vld [vmem:[%s1138_s3] sm:$0xff]  ;;  %v816_v17 = vld [vmem:[%s1140_s5 + $0x38] sm:$0xff]  ;;  %v815_v18 = vld [vmem:[%s1140_s5 + $0x30] sm:$0xff] }
   0xc   :  { %297 = vmatpush.bf16.msra.mxu2 %v816_v17  ;;  %v814_v19 = vld [vmem:[%s1140_s5 + $0x28] sm:$0xff]  ;;  %v813_v20 = vld [vmem:[%s1140_s5 + $0x20] sm:$0xff]  ;;  %v812_v29 = vld [vmem:[%s1140_s5 + $0x18] sm:$0xff] }
   0xd   :  { %v844_v22 = vld [vmem:[%s1137_s2] ss:$0 sm:$0xff]  ;;  %v811_v30 = vld [vmem:[%s1140_s5 + $0x10] sm:$0xff]  ;;  %v810_v31 = vld [vmem:[%s1140_s5 + $0x8] sm:$0xff] }
   0xe   :  { %130 = vmatpush.bf16.msra.mxu0 %v797_v6  ;;  %v809_v32 = vld [vmem:[%s1140_s5] sm:$0xff]  ;;  %v824_v33 = vld [vmem:[%s1144_s9 + $0x38] sm:$0xff]  ;;  %v823_v34 = vld [vmem:[%s1144_s9 + $0x30] sm:$0xff] }
   0xf   :  { %215 = vmatpush.bf16.msra.mxu1 %v805_v7  ;;  %392 = vmatpush.bf16.msra.mxu3 %v824_v33  ;;  %v822_v35 = vld [vmem:[%s1144_s9 + $0x28] sm:$0xff]  ;;  %v821_v36 = vld [vmem:[%s1144_s9 + $0x20] sm:$0xff]  ;;  %v820_v45 = vld [vmem:[%s1144_s9 + $0x18] sm:$0xff] }
  0x10   :  { %298 = vmatpush.bf16.msra.mxu2 %v815_v18  ;;  %v845_v38 = vld [vmem:[%s1139_s4] ss:$0 sm:$0xff]  ;;  %v819_v46 = vld [vmem:[%s1144_s9 + $0x10] sm:$0xff]  ;;  %v818_v47 = vld [vmem:[%s1144_s9 + $0x8] sm:$0xff] }
  0x11   :  { %v817_v48 = vld [vmem:[%s1144_s9] sm:$0xff]  ;;  %v832_v49 = vld [vmem:[%s1146_s11 + $0x38] sm:$0xff]  ;;  %v831_v50 = vld [vmem:[%s1146_s11 + $0x30] sm:$0xff] }
  0x12   :  { %131 = vmatpush.bf16.msra.mxu0 %v796_v8  ;;  %v830_v51 = vld [vmem:[%s1146_s11 + $0x28] sm:$0xff]  ;;  %v829_v52 = vld [vmem:[%s1146_s11 + $0x20] sm:$0xff]  ;;  %v828_v1 = vld [vmem:[%s1146_s11 + $0x18] sm:$0xff] }
  0x13   :  { %216 = vmatpush.bf16.msra.mxu1 %v804_v13  ;;  %393 = vmatpush.bf16.msra.mxu3 %v823_v34  ;;  %v846_v54 = vld [vmem:[%s1141_s6] ss:$0 sm:$0xff]  ;;  %v827_v2 = vld [vmem:[%s1146_s11 + $0x10] sm:$0xff]  ;;  %v826_v3 = vld [vmem:[%s1146_s11 + $0x8] sm:$0xff] }
  0x14   :  { %299 = vmatpush.bf16.msra.mxu2 %v814_v19  ;;  %v847_v56 = vld [vmem:[%s1142_s7] ss:$0 sm:$0xff]  ;;  %v840_v5 = vld [vmem:[%s1148_s13 + $0x38] sm:$0xff]  ;;  %v839_v6 = vld [vmem:[%s1148_s13 + $0x30] sm:$0xff] }
  0x15   :  { %v848_v60 = vld [vmem:[%s1143_s8] ss:$0 sm:$0xff]  ;;  %v838_v7 = vld [vmem:[%s1148_s13 + $0x28] sm:$0xff]  ;;  %v836_v17 = vld [vmem:[%s1148_s13 + $0x18] sm:$0xff]  ;;  %s879_s8 = smov 128  }
  0x16   :  { %132 = vmatpush.bf16.msra.mxu0 %v795_v9  ;;  %v825_v4 = vld [vmem:[%s1146_s11] sm:$0xff]  ;;  %v835_v18 = vld [vmem:[%s1148_s13 + $0x10] sm:$0xff]  ;;  %v834_v19 = vld [vmem:[%s1148_s13 + $0x8] sm:$0xff] }
  0x17   :  { %217 = vmatpush.bf16.msra.mxu1 %v803_v14  ;;  %394 = vmatpush.bf16.msra.mxu3 %v822_v35  ;;  %v837_v8 = vld [vmem:[%s1148_s13 + $0x20] sm:$0xff] }
  0x18   :  { %300 = vmatpush.bf16.msra.mxu2 %v813_v20  ;;  %v833_v20 = vld [vmem:[%s1148_s13] sm:$0xff]  ;;  %s878_s13 = smov [#allocation2]  }
  0x19   :  { %s582_s29 = sshll.u32 %s878_s13, 4  ;;  %s583_s29 = int_to_ptr.vmem [resolvable:$true] %s582_s29 }
  0x1a   :  { %133 = vmatpush.bf16.msra.mxu0 %v794_v10  ;;  %v849_v10 = vld [vmem:[%s1145_s10] ss:$0 sm:$0xff] }
  0x1b   :  { %218 = vmatpush.bf16.msra.mxu1 %v802_v15  ;;  %395 = vmatpush.bf16.msra.mxu3 %v821_v36 }
  0x1c   :  { %301 = vmatpush.bf16.msra.mxu2 %v812_v29  ;;  %v851_v29 = vld [vmem:[%s1149_s14] ss:$0 sm:$0xff] }
  0x1e   :  { %134 = vmatpush.bf16.msra.mxu0 %v793_v11 }
  0x1f   :  { %219 = vmatpush.bf16.msra.mxu1 %v801_v16  ;;  %396 = vmatpush.bf16.msra.mxu3 %v820_v45 }
  0x20   :  { %302 = vmatpush.bf16.msra.mxu2 %v811_v30 }
  0x21   :  { %135 = vmatmul.bf16.vlgmr.msra.gmra.mxu0 %v792_v12 }
  0x22   :  { %477 = vmatpush.bf16.msrb.mxu0 %v832_v49 }
  0x23   :  { %397 = vmatpush.bf16.msra.mxu3 %v819_v46  ;;  %562 = vmatpush.bf16.msrb.mxu1 %v840_v5 }
  0x24   :  { %303 = vmatpush.bf16.msra.mxu2 %v810_v31 }
  0x26   :  { %478 = vmatpush.bf16.msrb.mxu0 %v831_v50 }
  0x27   :  { %398 = vmatpush.bf16.msra.mxu3 %v818_v47  ;;  %563 = vmatpush.bf16.msrb.mxu1 %v839_v6 }
  0x28   :  { %304 = vmatpush.bf16.msra.mxu2 %v809_v32 }
  0x2a   :  { %479 = vmatpush.bf16.msrb.mxu0 %v830_v51 }
  0x2b   :  { %399 = vmatpush.bf16.msra.mxu3 %v817_v48  ;;  %564 = vmatpush.bf16.msrb.mxu1 %v838_v7 }
  0x2e   :  { %480 = vmatpush.bf16.msrb.mxu0 %v829_v52 }
  0x2f   :  { %565 = vmatpush.bf16.msrb.mxu1 %v837_v8 }
  0x32   :  { %481 = vmatpush.bf16.msrb.mxu0 %v828_v1 }
  0x33   :  { %566 = vmatpush.bf16.msrb.mxu1 %v836_v17 }
  0x36   :  { %482 = vmatpush.bf16.msrb.mxu0 %v827_v2 }
  0x37   :  { %567 = vmatpush.bf16.msrb.mxu1 %v835_v18 }
  0x3a   :  { %483 = vmatpush.bf16.msrb.mxu0 %v826_v3 }
  0x3b   :  { %568 = vmatpush.bf16.msrb.mxu1 %v834_v19 }
  0x3e   :  { %484 = vmatpush.bf16.msrb.mxu0 %v825_v4 }
  0x3f   :  { %569 = vmatpush.bf16.msrb.mxu1 %v833_v20 }
  0x9e   :  { %v136_v21 = vpop.f32.mrf.mxu0 }
  0x9f   :  { %v137_v23 = vadd.f32 %v844_v22, %v136_v21 }
  0xa1   :  { %v141_v26 = vmax.f32 %v137_v23, 0.0 }
  0xa6   :  { %v138_v24 = vpop.f32.mrf.mxu0 }
  0xa7   :  { %v139_v25 = vadd.f32 %v844_v22, %v138_v24  ;;  %v850_v22 = vld [vmem:[%s1147_s12] ss:$0 sm:$0xff]  ;;  %s584_s12 = sshll.u32 %s1150_s15, 4  ;;  %s585_s12 = int_to_ptr.hbm [resolvable:$true] %s584_s12 }
  0xa9   :  { %v142_v27 = vmax.f32 %v139_v25, 0.0 }
  0xab   :  { %v143_v28 = vpack.c.bf16 %v142_v27, %v141_v26 }
  0xad   :  { %220 = vmatmul.bf16.vlgmr.msra.gmra.mxu1 %v143_v28 }
 0x12a   :  { %v221_v37 = vpop.f32.mrf.mxu1 }
 0x12b   :  { %v222_v39 = vadd.f32 %v845_v38, %v221_v37 }
 0x12d   :  { %v226_v42 = vmax.f32 %v222_v39, 0.0 }
 0x132   :  { %v223_v40 = vpop.f32.mrf.mxu1 }
 0x133   :  { %v224_v41 = vadd.f32 %v845_v38, %v223_v40 }
 0x135   :  { %v227_v43 = vmax.f32 %v224_v41, 0.0 }
 0x137   :  { %v228_v44 = vpack.c.bf16 %v227_v43, %v226_v42 }
 0x139   :  { %305 = vmatmul.bf16.vlgmr.msra.gmra.mxu2 %v228_v44 }
 0x1bc   :  { %v306_v53 = vpop.f32.mrf.mxu2 }
 0x1bd   :  { %v307_v55 = vadd.f32 %v846_v54, %v306_v53 }
 0x1bf   :  { %v315_v58 = vmul.f32 %v847_v56, %v307_v55 }
 0x1c1   :  { %v321_v62 = vadd.f32 %v848_v60, %v315_v58 }
 0x1c4   :  { %v308_v57 = vpop.f32.mrf.mxu2 }
 0x1c5   :  { %v309_v59 = vadd.f32 %v846_v54, %v308_v57 }
 0x1c7   :  { %v316_v61 = vmul.f32 %v847_v56, %v309_v59 }
 0x1c9   :  { %v322_v63 = vadd.f32 %v848_v60, %v316_v61 }
 0x1cb   :  { %v323_v0 = vpack.c.bf16 %v322_v63, %v321_v62 }
 0x1cd   :  { %400 = vmatmul.bf16.vlgmr.msra.gmra.mxu3 %v323_v0 }
 0x250   :  { %v401_v9 = vpop.f32.mrf.mxu3 }
 0x251   :  { %v402_v11 = vadd.f32 %v849_v10, %v401_v9 }
 0x253   :  { %v406_v14 = vmax.f32 %v402_v11, 0.0 }
 0x258   :  { %v403_v12 = vpop.f32.mrf.mxu3 }
 0x259   :  { %v404_v13 = vadd.f32 %v849_v10, %v403_v12 }
 0x25b   :  { %v407_v15 = vmax.f32 %v404_v13, 0.0 }
 0x25d   :  { %v408_v16 = vpack.c.bf16 %v407_v15, %v406_v14 }
 0x25f   :  { %485 = vmatmul.bf16.vlgmr.msrb.gmra.mxu0 %v408_v16 }
 0x2dc   :  { %v486_v21 = vpop.f32.mrf.mxu0 }
 0x2dd   :  { %v487_v23 = vadd.f32 %v850_v22, %v486_v21 }
 0x2df   :  { %v491_v26 = vmax.f32 %v487_v23, 0.0 }
 0x2e4   :  { %v488_v24 = vpop.f32.mrf.mxu0 }
 0x2e5   :  { %v489_v25 = vadd.f32 %v850_v22, %v488_v24 }
 0x2e7   :  { %v492_v27 = vmax.f32 %v489_v25, 0.0 }
 0x2e9   :  { %v493_v28 = vpack.c.bf16 %v492_v27, %v491_v26 }
 0x2eb   :  { %570 = vmatmul.bf16.vlgmr.msrb.gmra.mxu1 %v493_v28 }
 0x368   :  { %v571_v30 = vpop.f32.mrf.mxu1 }
 0x369   :  { %v572_v31 = vadd.f32 %v851_v29, %v571_v30 }
 0x36b   :  { %576 = vst [vmem:[#allocation2] sm:$0xff] %v572_v31 }
 0x370   :  { %v573_v32 = vpop.f32.mrf.mxu1 }
 0x371   :  { %v574_v33 = vadd.f32 %v851_v29, %v573_v32 }
 0x373   :  { %577 = vst [vmem:[#allocation2 + $0x8] sm:$0xff] %v574_v33 }
 0x374   :  { %590 = dma.vmem_to_hbm [thread:$0]  %s583_s29, 256, %s585_s12, [#allocation3], %s879_s8, %s879_s8, %s880_s16  }
 0x375   :  { %876 = dma.done.wait [#allocation3], 256  }
 0x376   :  { %877 = vsyncadd [#allocation3], 4294967040 }
 0x377   :  { %595 = vsyncpa [#allocation3], 1 }

</bundles_post_ra>
